<compile_context>
chip_gen: v6e
topology: v6e:2x2x1
jax: 0.10.0
libtpu: 0.0.40
codegen_flags: <defaults>
</compile_context>

<pallas_src>
import jax
import jax.numpy as jnp
from jax.experimental import pallas as pl
from jax.experimental.pallas import tpu as pltpu

NUM_STAGES = 2           # operation_count
NUM_OPS = 4              # identity, brightness, contrast, invert
_PARAMS_PER_STAGE = 6    # [a = p0-p3, b = p3, p1, p2, m, c = 1+m]

_TILE_BYTES = 3 * 1024 * 1024   # per-block bytes; x2 dbl-buf x (in+out) = 12 MiB


def _round_up(x, m):
    return ((x + m - 1) // m) * m


def _pick_tile_rows(rows, row_align, max_tile_rows):
    """Pick a row-tile that (a) fits the VMEM byte budget, (b) gives >= 2 grid
    steps when possible (v7x megacore), and (c) divides `rows` evenly when such
    an aligned divisor exists (avoids a ragged, masked last block)."""
    if rows <= row_align:
        return rows                      # single block == full row extent
    cap = min(max_tile_rows, _round_up(pl.cdiv(rows, 2), row_align))
    cap = min(cap, rows)
    cap = max((cap // row_align) * row_align, row_align)
    t = cap
    while t >= row_align:                # largest aligned divisor <= cap
        if rows % t == 0:
            return t
        t -= row_align
    return cap                           # no aligned divisor: ragged last tile


def _make_kernel(num_stages, compute_dtype):
    def subpolicy_kernel(params_ref, x_ref, o_ref):
        """params_ref: SMEM (num_stages*6,) f32 precomputed per-stage scalars.
           x_ref     : VMEM (tile_rows, lanes) input tile.
           o_ref     : VMEM (tile_rows, lanes) output tile."""
        img = x_ref[...].astype(compute_dtype)
        # Stages applied sequentially, statically unrolled (num_stages is tiny).
        for s in range(num_stages):
            base = s * _PARAMS_PER_STAGE
            a = params_ref[base + 0].astype(compute_dtype)   # p0 - p3
            b = params_ref[base + 1].astype(compute_dtype)   # p3
            p1 = params_ref[base + 2].astype(compute_dtype)
            p2 = params_ref[base + 3].astype(compute_dtype)
            m = params_ref[base + 4].astype(compute_dtype)
            c = params_ref[base + 5].astype(compute_dtype)   # 1 + m
            bright = jnp.clip(img + m, 0.0, 1.0)             # brightness shift
            contrast = jnp.clip(img * c, 0.0, 1.0)           # contrast scale
            # p0*img + p3*(1-img) folded into a*img + b.
            img = a * img + p1 * bright + p2 * contrast + b
        o_ref[...] = img.astype(o_ref.dtype)

    return subpolicy_kernel


def subpolicy_forward(x, y, stage_weights, stage_mags):
    """x: (B, C, H, W) image batch.  y: labels, unused by these augmentation ops."""
    del y  # passed through unused, matching the reference augmentation ops
    orig_shape = x.shape
    io_dtype = x.dtype
    total = x.size
    itemsize = jnp.dtype(io_dtype).itemsize
    row_align = {4: 8, 2: 16, 1: 32}.get(itemsize, 8)
    # bf16 inputs stay in bf16 end-to-end (v6e/v7x bf16 VALU, half the bytes);
    # everything else computes in f32.
    compute_dtype = jnp.bfloat16 if io_dtype == jnp.bfloat16 else jnp.float32

    # --- tiny parameter glue stays in JAX (not worth a kernel) ---
    probs = jax.nn.softmax(stage_weights.astype(jnp.float32), axis=-1)
    mags = stage_mags.astype(jnp.float32)
    a = probs[:, 0] - probs[:, 3]
    b = probs[:, 3]
    p1 = probs[:, 1]
    p2 = probs[:, 2]
    c = 1.0 + mags
    # Flat 1-D SMEM layout avoids 2-D SMEM (8,128)-word padding.
    params = jnp.stack([a, b, p1, p2, mags, c], axis=-1).reshape(-1)

    # --- lane-dense layout with NO extra HBM pass: pick the widest lane count
    # (multiple of 128, <= 1024) that divides the element count, so the
    # flatten is a free reshape (no pad before, no slice after). ---
    lanes = 0
    for cand in range(1024, 0, -128):
        if total % cand == 0:
            lanes = cand
            break

    if lanes:
        rows = total // lanes
        x2d = x.reshape(rows, lanes)
        pad = 0
    else:
        # TODO(synk): ragged fallback keeps the old pad+slice path, which costs
        # one extra HBM read+write pass; only hit when total % 128 != 0.
        lanes = 1024
        rows = pl.cdiv(total, lanes)
        pad = rows * lanes - total
        x2d = jnp.pad(x.reshape(-1), (0, pad)).reshape(rows, lanes)

    max_tile_rows = max(
        row_align, (_TILE_BYTES // (lanes * itemsize)) // row_align * row_align
    )
    tile_rows = _pick_tile_rows(rows, row_align, max_tile_rows)
    grid = (pl.cdiv(rows, tile_rows),)

    out2d = pl.pallas_call(
        _make_kernel(NUM_STAGES, compute_dtype),
        out_shape=jax.ShapeDtypeStruct((rows, lanes), io_dtype),
        grid=grid,
        in_specs=[
            pl.BlockSpec(memory_space=pltpu.MemorySpace.SMEM),       # params
            pl.BlockSpec((tile_rows, lanes), lambda i: (i, 0)),      # image tile
        ],
        out_specs=pl.BlockSpec((tile_rows, lanes), lambda i: (i, 0)),
        compiler_params=pltpu.CompilerParams(
            dimension_semantics=("parallel",),   # shard tiles across TCs (v7x)
        ),
    )(params, x2d)

    out_flat = out2d.reshape(-1)
    if pad:
        out_flat = out_flat[:total]
    return out_flat.reshape(orig_shape)


def reference_forward(x, y, stage_weights, stage_mags):
    """Pure-JAX reference of the same chained soft-mixture stages (unfolded)."""
    del y
    probs = jax.nn.softmax(stage_weights.astype(jnp.float32), axis=-1)
    img = x.astype(jnp.float32)
    for s in range(NUM_STAGES):
        m = stage_mags[s].astype(jnp.float32)
        ops = jnp.stack(
            [img,
             jnp.clip(img + m, 0.0, 1.0),
             jnp.clip(img * (1.0 + m), 0.0, 1.0),
             1.0 - img],
            axis=0,
        )
        img = jnp.sum(probs[s].reshape(-1, 1, 1, 1, 1) * ops, axis=0)
    return img


if __name__ == "__main__":
    key = jax.random.PRNGKey(0)
    kx, ky = jax.random.split(key)

    B, C, H, W = 2, 4, 16, 16
    x = jax.random.uniform(kx, (B, C, H, W), dtype=jnp.float32)
    y = jax.random.randint(ky, (B,), 0, 10, dtype=jnp.int32)

    # Deterministic params (mirrors nn.Parameter(torch.ones(...)) stage weights;
    # fixed small per-stage magnitudes).
    stage_weights = jnp.ones((NUM_STAGES, NUM_OPS), dtype=jnp.float32)
    stage_mags = jnp.array([0.3, 0.1], dtype=jnp.float32)

    fwd = jax.jit(subpolicy_forward)

    # f32 path: exact-precision check against the pure-JAX reference.
    out = jax.block_until_ready(fwd(x, y, stage_weights, stage_mags))
    ref = reference_forward(x, y, stage_weights, stage_mags).astype(x.dtype)
    assert out.shape == x.shape and out.dtype == x.dtype
    assert jnp.allclose(out, ref, atol=1e-5, rtol=1e-5)

    # bf16 streaming path (the v6e/v7x fast path): loose-tolerance smoke check.
    x_bf16 = x.astype(jnp.bfloat16)
    out_bf16 = jax.block_until_ready(fwd(x_bf16, y, stage_weights, stage_mags))
    assert out_bf16.shape == x.shape and out_bf16.dtype == jnp.bfloat16
    assert jnp.allclose(out_bf16.astype(jnp.float32), ref, atol=8e-2, rtol=5e-2)

    print("KERNEL_OK")
</pallas_src>

<mosaic_0001>
module attributes {stable_mosaic.version = 11 : i64} {
  func.func @subpolicy_kernel(%arg0: i32, %arg1: memref<12xf32, #tpu.memory_space<smem>>, %arg2: memref<2x1024xf32, #tpu.memory_space<vmem>>, %arg3: memref<2x1024xf32, #tpu.memory_space<vmem>>) attributes {dimension_semantics = [#tpu.dimension_semantics<parallel>], iteration_bounds = array<i64: 1>, scalar_prefetch = 0 : i64, scratch_operands = 0 : i64, tpu.core_type = #tpu.core_type<tc>, window_params = [{transform_indices = @transform_0, window_bounds = array<i64: 12>}, {transform_indices = @transform_1, window_bounds = array<i64: 2, 1024>}, {transform_indices = @transform_2, window_bounds = array<i64: 2, 1024>}]} {
    %c0 = arith.constant 0 : index
    %c0_0 = arith.constant 0 : index
    %0 = vector.load %arg2[%c0, %c0_0] : memref<2x1024xf32, #tpu.memory_space<vmem>>, vector<2x1024xf32>
    %c0_1 = arith.constant 0 : index
    %1 = memref.load %arg1[%c0_1] : memref<12xf32, #tpu.memory_space<smem>>
    %c1 = arith.constant 1 : index
    %2 = memref.load %arg1[%c1] : memref<12xf32, #tpu.memory_space<smem>>
    %c2 = arith.constant 2 : index
    %3 = memref.load %arg1[%c2] : memref<12xf32, #tpu.memory_space<smem>>
    %c3 = arith.constant 3 : index
    %4 = memref.load %arg1[%c3] : memref<12xf32, #tpu.memory_space<smem>>
    %c4 = arith.constant 4 : index
    %5 = memref.load %arg1[%c4] : memref<12xf32, #tpu.memory_space<smem>>
    %c5 = arith.constant 5 : index
    %6 = memref.load %arg1[%c5] : memref<12xf32, #tpu.memory_space<smem>>
    %7 = vector.broadcast %5 : f32 to vector<2x1024xf32>
    %8 = arith.addf %0, %7 : vector<2x1024xf32>
    %cst = arith.constant 0.000000e+00 : f32
    %cst_2 = arith.constant 1.000000e+00 : f32
    %9 = vector.broadcast %cst : f32 to vector<2x1024xf32>
    %10 = arith.maximumf %9, %8 : vector<2x1024xf32>
    %11 = vector.broadcast %cst_2 : f32 to vector<2x1024xf32>
    %12 = arith.minimumf %11, %10 : vector<2x1024xf32>
    %13 = vector.broadcast %6 : f32 to vector<2x1024xf32>
    %14 = arith.mulf %0, %13 : vector<2x1024xf32>
    %cst_3 = arith.constant 0.000000e+00 : f32
    %cst_4 = arith.constant 1.000000e+00 : f32
    %15 = vector.broadcast %cst_3 : f32 to vector<2x1024xf32>
    %16 = arith.maximumf %15, %14 : vector<2x1024xf32>
    %17 = vector.broadcast %cst_4 : f32 to vector<2x1024xf32>
    %18 = arith.minimumf %17, %16 : vector<2x1024xf32>
    %19 = vector.broadcast %1 : f32 to vector<2x1024xf32>
    %20 = arith.mulf %19, %0 : vector<2x1024xf32>
    %21 = vector.broadcast %3 : f32 to vector<2x1024xf32>
    %22 = arith.mulf %21, %12 : vector<2x1024xf32>
    %23 = arith.addf %20, %22 : vector<2x1024xf32>
    %24 = vector.broadcast %4 : f32 to vector<2x1024xf32>
    %25 = arith.mulf %24, %18 : vector<2x1024xf32>
    %26 = arith.addf %23, %25 : vector<2x1024xf32>
    %27 = vector.broadcast %2 : f32 to vector<2x1024xf32>
    %28 = arith.addf %26, %27 : vector<2x1024xf32>
    %c6 = arith.constant 6 : index
    %29 = memref.load %arg1[%c6] : memref<12xf32, #tpu.memory_space<smem>>
    %c7 = arith.constant 7 : index
    %30 = memref.load %arg1[%c7] : memref<12xf32, #tpu.memory_space<smem>>
    %c8 = arith.constant 8 : index
    %31 = memref.load %arg1[%c8] : memref<12xf32, #tpu.memory_space<smem>>
    %c9 = arith.constant 9 : index
    %32 = memref.load %arg1[%c9] : memref<12xf32, #tpu.memory_space<smem>>
    %c10 = arith.constant 10 : index
    %33 = memref.load %arg1[%c10] : memref<12xf32, #tpu.memory_space<smem>>
    %c11 = arith.constant 11 : index
    %34 = memref.load %arg1[%c11] : memref<12xf32, #tpu.memory_space<smem>>
    %35 = vector.broadcast %33 : f32 to vector<2x1024xf32>
    %36 = arith.addf %28, %35 : vector<2x1024xf32>
    %cst_5 = arith.constant 0.000000e+00 : f32
    %cst_6 = arith.constant 1.000000e+00 : f32
    %37 = vector.broadcast %cst_5 : f32 to vector<2x1024xf32>
    %38 = arith.maximumf %37, %36 : vector<2x1024xf32>
    %39 = vector.broadcast %cst_6 : f32 to vector<2x1024xf32>
    %40 = arith.minimumf %39, %38 : vector<2x1024xf32>
    %41 = vector.broadcast %34 : f32 to vector<2x1024xf32>
    %42 = arith.mulf %28, %41 : vector<2x1024xf32>
    %cst_7 = arith.constant 0.000000e+00 : f32
    %cst_8 = arith.constant 1.000000e+00 : f32
    %43 = vector.broadcast %cst_7 : f32 to vector<2x1024xf32>
    %44 = arith.maximumf %43, %42 : vector<2x1024xf32>
    %45 = vector.broadcast %cst_8 : f32 to vector<2x1024xf32>
    %46 = arith.minimumf %45, %44 : vector<2x1024xf32>
    %47 = vector.broadcast %29 : f32 to vector<2x1024xf32>
    %48 = arith.mulf %47, %28 : vector<2x1024xf32>
    %49 = vector.broadcast %31 : f32 to vector<2x1024xf32>
    %50 = arith.mulf %49, %40 : vector<2x1024xf32>
    %51 = arith.addf %48, %50 : vector<2x1024xf32>
    %52 = vector.broadcast %32 : f32 to vector<2x1024xf32>
    %53 = arith.mulf %52, %46 : vector<2x1024xf32>
    %54 = arith.addf %51, %53 : vector<2x1024xf32>
    %55 = vector.broadcast %30 : f32 to vector<2x1024xf32>
    %56 = arith.addf %54, %55 : vector<2x1024xf32>
    %c0_9 = arith.constant 0 : index
    %c0_10 = arith.constant 0 : index
    %57 = vector.load %arg3[%c0_9, %c0_10] : memref<2x1024xf32, #tpu.memory_space<vmem>>, vector<2x1024xf32>
    tpu.vector_store %arg3[%c0_9, %c0_10], %56 {strides = array<i32>} : memref<2x1024xf32, #tpu.memory_space<vmem>>, vector<2x1024xf32>,
    return
  }
  func.func @transform_0(%arg0: i32) -> i32 {
    %c0_i32 = arith.constant 0 : i32
    %c0_i32_0 = arith.constant 0 : i32
    return %c0_i32 : i32
  }
  func.func @transform_1(%arg0: i32) -> (i32, i32) {
    %c0_i32 = arith.constant 0 : i32
    %c0_i32_0 = arith.constant 0 : i32
    return %arg0, %c0_i32 : i32, i32
  }
  func.func @transform_2(%arg0: i32) -> (i32, i32) {
    %c0_i32 = arith.constant 0 : i32
    %c0_i32_0 = arith.constant 0 : i32
    return %arg0, %c0_i32 : i32, i32
  }
}

</mosaic_0001>

<bundles_post_ra>
// kernel: subpolicy_forward.1
= control target key start
LH: loop header
LB: loop body
LE: loop exit
PB: predicated region body
PF: predicated region fallthrough
CT: control target
= control target key end

     0   :  { %7 = vsyncpa [#allocation3], 0  ;;  %s171_s0 = inlined_call_operand.vmem [shape: f32[12], index: 0, kind: input, shape index: {}]   ;;  %s172_s1 = inlined_call_operand.vmem [shape: f32[2,1024], index: 1, kind: input, shape index: {}]   ;;  %s173_s2 = inlined_call_operand.vmem [shape: f32[2,1024], index: 2, kind: output, shape index: {}]  }
   0x1   :  { %s14_s11 = sshll.u32 %s171_s0, 4  ;;  %s15_s11 = int_to_ptr.vmem [resolvable:$true] %s14_s11 }
   0x2   :  { %s117_s12 = scalar_lea.vmem %s15_s11, 16  ;;  %p122_p1 = scmp.lt.s32.totalorder %s15_s11, %s15_s11 }
   0x3   :  { %p118_p0 = scmp.ne.s32.totalorder %s15_s11, %s117_s12  ;;  %p123_p2 = scmp.lt.s32.totalorder %s117_s12, %s117_s12 }
   0x5   :  { %p124_p3 = por %p123_p2, %p122_p1 }
   0x7   :  { %p125_p4 = pnand %p124_p3, %p118_p0 }
   0x9   :  { %128 = shalt.err (!%p125_p4)
}
   0xa   :  { %s131_s13 = smov [#allocation2]  }
   0xb   :  { %17 = dma.vmem_to_smem %s15_s11, 16, %s131_s13, [#allocation3]  }
   0xc   :  { %129 = dma.done.wait [#allocation3], 16  }
   0xd   :  { %130 = vsyncadd [#allocation3], 4294967280 }
   0xe   :  { %23 = sfence }
   0xf   :  { %s26_s14 = sld [smem:[#allocation2]]  ;;  %v24_v0 = vld [vmem:[%s172_s1] sm:$0xff]  ;;  %v25_v1 = vld [vmem:[%s172_s1 + $0x8] sm:$0xff] }
  0x10   :  { %s108_s15 = sld [smem:[#allocation2 + $0x4]] }
  0x11   :  { %s109_s16 = sld [smem:[#allocation2 + $0x5]] }
  0x12   :  { %s106_s17 = sld [smem:[#allocation2 + $0x2]] }
  0x13   :  { %s107_s18 = sld [smem:[#allocation2 + $0x3]] }
  0x14   :  { %s156_s22 = sld [smem:[#allocation2 + $0x1]] }
  0x15   :  { %v46_v5 = vstv %s26_s14  ;;  %s158_s23 = sld [smem:[#allocation2 + $0xa]] }
  0x16   :  { %v32_v2 = vstv %s108_s15  ;;  %v47_v12 = vmul.f32 %v46_v5, %v24_v0  ;;  %s115_s24 = sld [smem:[#allocation2 + $0xb]]  ;;  %v48_v18 = vmul.f32 %v46_v5, %v25_v1 }
  0x17   :  { %v33_v3 = vadd.f32 %v32_v2, %v24_v0  ;;  %v39_v4 = vstv %s109_s16  ;;  %v34_v6 = vadd.f32 %v32_v2, %v25_v1  ;;  %s160_s1 = sld [smem:[#allocation2 + $0x6]] }
  0x18   :  { %v40_v7 = vmul.f32 %v39_v4, %v24_v0  ;;  %v41_v8 = vmul.f32 %v39_v4, %v25_v1  ;;  %v49_v13 = vstv %s106_s17  ;;  %s112_s25 = sld [smem:[#allocation2 + $0x8]] }
  0x19   :  { %v35_v9 = vmax.f32 %v33_v3, 0.0  ;;  %v36_v10 = vmax.f32 %v34_v6, 0.0  ;;  %v54_v16 = vstv %s107_s18  ;;  %s113_s26 = sld [smem:[#allocation2 + $0x9]] }
  0x1a   :  { %v42_v11 = vmax.f32 %v40_v7, 0.0  ;;  %v43_v14 = vmax.f32 %v41_v8, 0.0  ;;  %v59_v27 = vstv %s156_s22  ;;  %s111_s27 = sld [smem:[#allocation2 + $0x7]] }
  0x1b   :  { %v37_v15 = vmin.f32 %v35_v9, 1.0  ;;  %v38_v17 = vmin.f32 %v36_v10, 1.0  ;;  %v68_v30 = vstv %s158_s23 }
  0x1c   :  { %v44_v19 = vmin.f32 %v42_v11, 1.0  ;;  %v45_v20 = vmin.f32 %v43_v14, 1.0  ;;  %v75_v31 = vstv %s115_s24 }
  0x1d   :  { %v50_v21 = vmul.f32 %v49_v13, %v37_v15  ;;  %v51_v22 = vmul.f32 %v49_v13, %v38_v17  ;;  %v82_v36 = vstv %s160_s1 }
  0x1e   :  { %v55_v23 = vmul.f32 %v54_v16, %v44_v19  ;;  %v56_v24 = vmul.f32 %v54_v16, %v45_v20  ;;  %v85_v43 = vstv %s112_s25 }
  0x1f   :  { %v52_v25 = vadd.f32 %v50_v21, %v47_v12  ;;  %v53_v26 = vadd.f32 %v51_v22, %v48_v18  ;;  %v90_v44 = vstv %s113_s26 }
  0x20   :  { %v95_v57 = vstv %s111_s27 }
  0x21   :  { %v57_v28 = vadd.f32 %v55_v23, %v52_v25  ;;  %v58_v29 = vadd.f32 %v56_v24, %v53_v26 }
  0x23   :  { %v60_v32 = vadd.f32 %v59_v27, %v57_v28  ;;  %v61_v33 = vadd.f32 %v59_v27, %v58_v29 }
  0x25   :  { %v69_v34 = vadd.f32 %v68_v30, %v60_v32  ;;  %v76_v35 = vmul.f32 %v75_v31, %v60_v32  ;;  %v70_v37 = vadd.f32 %v68_v30, %v61_v33  ;;  %v77_v38 = vmul.f32 %v75_v31, %v61_v33 }
  0x26   :  { %v83_v42 = vmul.f32 %v82_v36, %v60_v32  ;;  %v84_v49 = vmul.f32 %v82_v36, %v61_v33 }
  0x27   :  { %v71_v39 = vmax.f32 %v69_v34, 0.0  ;;  %v78_v40 = vmax.f32 %v76_v35, 0.0  ;;  %v72_v41 = vmax.f32 %v70_v37, 0.0  ;;  %v79_v45 = vmax.f32 %v77_v38, 0.0 }
  0x29   :  { %v73_v46 = vmin.f32 %v71_v39, 1.0  ;;  %v80_v47 = vmin.f32 %v78_v40, 1.0  ;;  %v74_v48 = vmin.f32 %v72_v41, 1.0  ;;  %v81_v50 = vmin.f32 %v79_v45, 1.0 }
  0x2b   :  { %v86_v51 = vmul.f32 %v85_v43, %v73_v46  ;;  %v91_v52 = vmul.f32 %v90_v44, %v80_v47  ;;  %v87_v53 = vmul.f32 %v85_v43, %v74_v48  ;;  %v92_v54 = vmul.f32 %v90_v44, %v81_v50 }
  0x2d   :  { %v88_v55 = vadd.f32 %v86_v51, %v83_v42  ;;  %v89_v56 = vadd.f32 %v87_v53, %v84_v49 }
  0x2f   :  { %v93_v58 = vadd.f32 %v91_v52, %v88_v55  ;;  %v94_v59 = vadd.f32 %v92_v54, %v89_v56 }
  0x31   :  { %v96_v60 = vadd.f32 %v95_v57, %v93_v58  ;;  %v97_v61 = vadd.f32 %v95_v57, %v94_v59 }
  0x33   :  { %98 = vst [vmem:[%s173_s2] sm:$0xff] %v96_v60  ;;  %99 = vst [vmem:[%s173_s2 + $0x8] sm:$0xff] %v97_v61 }
  0x34   :  { %104 = vsyncpa [#allocation3], 1 }

</bundles_post_ra>
